<compile_context>
chip_gen: v7x
topology: tpu7x:2x2x1
jax: 0.10.0
libtpu: 0.0.40
codegen_flags: <defaults>
</compile_context>

<pallas_src>
import functools

import jax
import jax.numpy as jnp
import numpy as np
from jax.experimental import pallas as pl
from jax.experimental.pallas import tpu as pltpu

LANE = 128
SUB = 8


def _dice_sums_kernel(*refs, class_ids, ragged):
    # refs = (x_ref_0, ..., x_ref_{K-1}, t_ref, inter_ref, psum_ref, tsum_ref)
    #   x_ref_k:   (1, 1, G, 8, 128) f32   -- logits of selected class k
    #   t_ref:     (1, 1, G, 8, 128) i32   -- integer labels (-1 in ragged pad)
    #   inter/psum/tsum_ref: (1, K, 8, 128) f32 accumulators, resident across the
    #     spatial grid axis; the tiny final reduction happens in the wrapper.
    K = len(class_ids)
    x_refs = refs[:K]
    t_ref = refs[K]
    inter_ref, psum_ref, tsum_ref = refs[K + 1], refs[K + 2], refs[K + 3]

    s = pl.program_id(1)

    @pl.when(s == 0)
    def _init():
        inter_ref[...] = jnp.zeros_like(inter_ref)
        psum_ref[...] = jnp.zeros_like(psum_ref)
        tsum_ref[...] = jnp.zeros_like(tsum_ref)

    # Per-class (G, 8, 128) tiles; K is small & static -> Python unroll.
    xs = [x_refs[k][0, 0].astype(jnp.float32) for k in range(K)]

    # Numerically stable softmax across the K selected classes (pure VPU + EUP).
    m = xs[0]
    for k in range(1, K):
        m = jnp.maximum(m, xs[k])
    es = [jnp.exp(xs[k] - m) for k in range(K)]
    denom = es[0]
    for k in range(1, K):
        denom = denom + es[k]
    inv = pl.reciprocal(denom)  # exact: one reciprocal per pixel, K multiplies

    labels = t_ref[0, 0]  # (G, 8, 128) int32

    if ragged:
        # Pad pixels carry label -1; zeroing the reciprocal there zeroes every
        # per-class probability, which fixes psum (zero-padded logits are NOT
        # softmax-neutral).  inter/tsum are already correct via label compares.
        inv = jnp.where(labels >= 0, inv, 0.0)

    for k, cid in enumerate(class_ids):
        pk = es[k] * inv                      # masked softmax prob (zero in pad)
        mk = labels == cid                    # one-hot target as a mask
        inter_ref[0, k] += jnp.sum(jnp.where(mk, pk, 0.0), axis=0)
        psum_ref[0, k] += jnp.sum(pk, axis=0)
        tsum_ref[0, k] += jnp.sum(mk.astype(jnp.float32), axis=0)


def custom_soft_loss(logits, target, *, n_classes, class_ids):
    """Matches CustomSoftLoss(n_classes, class_ids).forward(input, target).

    logits: (B, C, H, W) float  (C == n_classes)
    target: (B, 1, H, W) integer labels in [0, n_classes)
    returns scalar float32 loss.
    """
    class_ids = tuple(int(c) for c in class_ids)
    B, C, H, W = logits.shape
    K = len(class_ids)
    S = H * W

    # Spatial tiling: lane-dense rows of 128; TR rows (multiple of 8, up to 512)
    # per grid step, presented to the kernel as G = TR//8 native (8,128) tiles.
    R = -(-S // LANE)                        # 128-lane rows needed
    TR = min(512, -(-R // SUB) * SUB)        # big tile (amortize grid overhead)
    R_pad = -(-R // TR) * TR
    S_pad = R_pad * LANE
    num_s = R_pad // TR
    G_pad = R_pad // SUB
    G_tile = TR // SUB
    ragged = S_pad != S

    # Keep 32-bit dtypes inside the kernel (native (8,128) tiles for any TR).
    if logits.dtype != jnp.float32:
        logits = logits.astype(jnp.float32)
    x_flat = logits.reshape(B, C, S)
    t_flat = target.reshape(B, 1, S)
    if t_flat.dtype != jnp.int32:
        t_flat = t_flat.astype(jnp.int32)

    if ragged:
        # Only the ragged case pays a pad copy; the common aligned case feeds the
        # kernel straight from the original logits (the reshape below is free).
        x_flat = jnp.pad(x_flat, ((0, 0), (0, 0), (0, S_pad - S)))
        t_flat = jnp.pad(t_flat, ((0, 0), (0, 0), (0, S_pad - S)),
                         constant_values=-1)

    x5 = x_flat.reshape(B, C, G_pad, SUB, LANE)
    t5 = t_flat.reshape(B, 1, G_pad, SUB, LANE)

    kernel = functools.partial(_dice_sums_kernel, class_ids=class_ids,
                               ragged=ragged)

    acc_shape = jax.ShapeDtypeStruct((B, K, SUB, LANE), jnp.float32)
    acc_spec = pl.BlockSpec((1, K, SUB, LANE), lambda b, s: (b, 0, 0, 0))

    def x_spec(cid):
        # Per-class block: the channel index is baked into the index_map, so only
        # the K selected channels are ever DMA'd from HBM (no gather pass).
        return pl.BlockSpec((1, 1, G_tile, SUB, LANE),
                            lambda b, s, _c=cid: (b, _c, s, 0, 0))

    t_spec = pl.BlockSpec((1, 1, G_tile, SUB, LANE),
                          lambda b, s: (b, 0, s, 0, 0))

    inter_out, psum_out, tsum_out = pl.pallas_call(
        kernel,
        out_shape=(acc_shape, acc_shape, acc_shape),
        grid=(B, num_s),
        in_specs=[x_spec(cid) for cid in class_ids] + [t_spec],
        out_specs=(acc_spec, acc_spec, acc_spec),
        compiler_params=pltpu.CompilerParams(
            dimension_semantics=("parallel", "arbitrary")),
    )(*([x5] * K), t5)

    # Tiny final reductions + Dice combine (scalar glue, kept in plain JAX).
    inter = inter_out.sum(axis=(2, 3))       # (B, K)
    psum = psum_out.sum(axis=(2, 3))         # (B, K)
    tsum = tsum_out.sum(axis=(2, 3))         # (B, K)

    smooth = 0.01
    score = jnp.sum(2.0 * (inter + smooth) / (psum + tsum + smooth))
    return 1.0 - score / (float(B) * float(n_classes))


def _reference_loss(logits, target, *, n_classes, class_ids):
    """Pure-JAX reference mirroring the PyTorch module exactly."""
    class_ids = jnp.asarray(class_ids, dtype=jnp.int32)
    B = logits.shape[0]
    smooth = 0.01
    x = logits[:, class_ids]                                            # (B, K, H, W)
    x = jax.nn.softmax(x.astype(jnp.float32), axis=1).reshape(B, len(class_ids), -1)
    t = jax.nn.one_hot(target[:, 0].astype(jnp.int32), n_classes,
                       dtype=jnp.float32)                               # (B, H, W, C)
    t = jnp.transpose(t, (0, 3, 1, 2)).reshape(B, n_classes, -1)
    t = t[:, class_ids, :]
    inter = jnp.sum(x * t, axis=2) + smooth
    union = jnp.sum(x, axis=2) + jnp.sum(t, axis=2) + smooth
    score = jnp.sum(2.0 * inter / union)
    return 1.0 - score / (float(B) * float(n_classes))


if __name__ == "__main__":
    # Module "configuration": 4 classes, use ids 1..3.
    n_classes = 4
    class_ids = (1, 2, 3)

    B, C, H, W = 2, n_classes, 16, 16
    key = jax.random.PRNGKey(0)
    k1, k2 = jax.random.split(key)
    logits = jax.random.normal(k1, (B, C, H, W), dtype=jnp.float32)
    target = jax.random.randint(k2, (B, 1, H, W), 0, n_classes, dtype=jnp.int32)

    loss = custom_soft_loss(logits, target, n_classes=n_classes, class_ids=class_ids)
    loss = jax.block_until_ready(loss)

    ref = _reference_loss(logits, target, n_classes=n_classes, class_ids=class_ids)
    ref = jax.block_until_ready(ref)

    if not np.allclose(np.asarray(loss), np.asarray(ref), rtol=1e-5, atol=1e-5):
        raise AssertionError(f"mismatch: kernel={float(loss)} ref={float(ref)}")

    print("KERNEL_OK")
</pallas_src>

<mosaic_0001>
module attributes {stable_mosaic.version = 11 : i64} {
  func.func @_dice_sums_kernel(%arg0: i32, %arg1: i32, %arg2: memref<1x1x1x8x128xf32, #tpu.memory_space<vmem>>, %arg3: memref<1x1x1x8x128xf32, #tpu.memory_space<vmem>>, %arg4: memref<1x1x1x8x128xf32, #tpu.memory_space<vmem>>, %arg5: memref<1x1x1x8x128xi32, #tpu.memory_space<vmem>>, %arg6: memref<1x3x8x128xf32, #tpu.memory_space<vmem>>, %arg7: memref<1x3x8x128xf32, #tpu.memory_space<vmem>>, %arg8: memref<1x3x8x128xf32, #tpu.memory_space<vmem>>) attributes {dimension_semantics = [#tpu.dimension_semantics<parallel>, #tpu.dimension_semantics<arbitrary>], iteration_bounds = array<i64: 2, 1>, scalar_prefetch = 0 : i64, scratch_operands = 0 : i64, tpu.core_type = #tpu.core_type<tc>, window_params = [{transform_indices = @transform_0, window_bounds = array<i64: 1, 1, 1, 8, 128>}, {transform_indices = @transform_1, window_bounds = array<i64: 1, 1, 1, 8, 128>}, {transform_indices = @transform_2, window_bounds = array<i64: 1, 1, 1, 8, 128>}, {transform_indices = @transform_3, window_bounds = array<i64: 1, 1, 1, 8, 128>}, {transform_indices = @transform_4, window_bounds = array<i64: 1, 3, 8, 128>}, {transform_indices = @transform_5, window_bounds = array<i64: 1, 3, 8, 128>}, {transform_indices = @transform_6, window_bounds = array<i64: 1, 3, 8, 128>}]} {
    %c0_i32 = arith.constant 0 : i32
    %0 = arith.cmpi eq, %arg1, %c0_i32 : i32
    %1 = arith.extui %0 : i1 to i32
    %c0_i32_0 = arith.constant 0 : i32
    %2 = arith.cmpi ne, %1, %c0_i32_0 : i32
    scf.if %2 {
      %cst_103 = arith.constant 0.000000e+00 : f32
      %110 = vector.broadcast %cst_103 : f32 to vector<1x3x8x128xf32>
      %c0_104 = arith.constant 0 : index
      %c0_105 = arith.constant 0 : index
      %c0_106 = arith.constant 0 : index
      %c0_107 = arith.constant 0 : index
      %111 = vector.load %arg6[%c0_104, %c0_105, %c0_106, %c0_107] : memref<1x3x8x128xf32, #tpu.memory_space<vmem>>, vector<1x3x8x128xf32>
      tpu.vector_store %arg6[%c0_104, %c0_105, %c0_106, %c0_107], %110 {strides = array<i32>} : memref<1x3x8x128xf32, #tpu.memory_space<vmem>>, vector<1x3x8x128xf32>,
      %cst_108 = arith.constant 0.000000e+00 : f32
      %112 = vector.broadcast %cst_108 : f32 to vector<1x3x8x128xf32>
      %c0_109 = arith.constant 0 : index
      %c0_110 = arith.constant 0 : index
      %c0_111 = arith.constant 0 : index
      %c0_112 = arith.constant 0 : index
      %113 = vector.load %arg7[%c0_109, %c0_110, %c0_111, %c0_112] : memref<1x3x8x128xf32, #tpu.memory_space<vmem>>, vector<1x3x8x128xf32>
      tpu.vector_store %arg7[%c0_109, %c0_110, %c0_111, %c0_112], %112 {strides = array<i32>} : memref<1x3x8x128xf32, #tpu.memory_space<vmem>>, vector<1x3x8x128xf32>,
      %cst_113 = arith.constant 0.000000e+00 : f32
      %114 = vector.broadcast %cst_113 : f32 to vector<1x3x8x128xf32>
      %c0_114 = arith.constant 0 : index
      %c0_115 = arith.constant 0 : index
      %c0_116 = arith.constant 0 : index
      %c0_117 = arith.constant 0 : index
      %115 = vector.load %arg8[%c0_114, %c0_115, %c0_116, %c0_117] : memref<1x3x8x128xf32, #tpu.memory_space<vmem>>, vector<1x3x8x128xf32>
      tpu.vector_store %arg8[%c0_114, %c0_115, %c0_116, %c0_117], %114 {strides = array<i32>} : memref<1x3x8x128xf32, #tpu.memory_space<vmem>>, vector<1x3x8x128xf32>,
    } else {
    }
    %c0 = arith.constant 0 : index
    %c0_1 = arith.constant 0 : index
    %c0_2 = arith.constant 0 : index
    %c0_3 = arith.constant 0 : index
    %c0_4 = arith.constant 0 : index
    %3 = vector.load %arg2[%c0, %c0_1, %c0_2, %c0_3, %c0_4] : memref<1x1x1x8x128xf32, #tpu.memory_space<vmem>>, vector<1x1x1x8x128xf32>
    %4 = vector.shape_cast %3 : vector<1x1x1x8x128xf32> to vector<1x8x128xf32>
    %c0_5 = arith.constant 0 : index
    %c0_6 = arith.constant 0 : index
    %c0_7 = arith.constant 0 : index
    %c0_8 = arith.constant 0 : index
    %c0_9 = arith.constant 0 : index
    %5 = vector.load %arg3[%c0_5, %c0_6, %c0_7, %c0_8, %c0_9] : memref<1x1x1x8x128xf32, #tpu.memory_space<vmem>>, vector<1x1x1x8x128xf32>
    %6 = vector.shape_cast %5 : vector<1x1x1x8x128xf32> to vector<1x8x128xf32>
    %c0_10 = arith.constant 0 : index
    %c0_11 = arith.constant 0 : index
    %c0_12 = arith.constant 0 : index
    %c0_13 = arith.constant 0 : index
    %c0_14 = arith.constant 0 : index
    %7 = vector.load %arg4[%c0_10, %c0_11, %c0_12, %c0_13, %c0_14] : memref<1x1x1x8x128xf32, #tpu.memory_space<vmem>>, vector<1x1x1x8x128xf32>
    %8 = vector.shape_cast %7 : vector<1x1x1x8x128xf32> to vector<1x8x128xf32>
    %9 = arith.maximumf %4, %6 : vector<1x8x128xf32>
    %10 = arith.maximumf %9, %8 : vector<1x8x128xf32>
    %11 = arith.subf %4, %10 : vector<1x8x128xf32>
    %12 = math.exp %11 : vector<1x8x128xf32>
    %13 = arith.subf %6, %10 : vector<1x8x128xf32>
    %14 = math.exp %13 : vector<1x8x128xf32>
    %15 = arith.subf %8, %10 : vector<1x8x128xf32>
    %16 = math.exp %15 : vector<1x8x128xf32>
    %17 = arith.addf %12, %14 : vector<1x8x128xf32>
    %18 = arith.addf %17, %16 : vector<1x8x128xf32>
    %19 = tpu.reciprocal %18 : vector<1x8x128xf32> -> vector<1x8x128xf32>
    %c0_15 = arith.constant 0 : index
    %c0_16 = arith.constant 0 : index
    %c0_17 = arith.constant 0 : index
    %c0_18 = arith.constant 0 : index
    %c0_19 = arith.constant 0 : index
    %20 = vector.load %arg5[%c0_15, %c0_16, %c0_17, %c0_18, %c0_19] : memref<1x1x1x8x128xi32, #tpu.memory_space<vmem>>, vector<1x1x1x8x128xi32>
    %21 = vector.shape_cast %20 : vector<1x1x1x8x128xi32> to vector<1x8x128xi32>
    %c0_i32_20 = arith.constant 0 : i32
    %22 = vector.broadcast %c0_i32_20 : i32 to vector<1x8x128xi32>
    %23 = arith.cmpi sge, %21, %22 : vector<1x8x128xi32>
    %cst = arith.constant 0.000000e+00 : f32
    %24 = vector.broadcast %cst : f32 to vector<1x8x128xf32>
    %25 = arith.select %23, %19, %24 : vector<1x8x128xi1>, vector<1x8x128xf32>
    %26 = arith.mulf %12, %25 : vector<1x8x128xf32>
    %c1_i32 = arith.constant 1 : i32
    %27 = vector.broadcast %c1_i32 : i32 to vector<1x8x128xi32>
    %28 = arith.cmpi eq, %21, %27 : vector<1x8x128xi32>
    %c0_21 = arith.constant 0 : index
    %c0_22 = arith.constant 0 : index
    %c0_23 = arith.constant 0 : index
    %c0_24 = arith.constant 0 : index
    %29 = vector.load %arg6[%c0_21, %c0_22, %c0_23, %c0_24] : memref<1x3x8x128xf32, #tpu.memory_space<vmem>>, vector<1x1x8x128xf32>
    %30 = vector.shape_cast %29 : vector<1x1x8x128xf32> to vector<8x128xf32>
    %cst_25 = arith.constant 0.000000e+00 : f32
    %31 = vector.broadcast %cst_25 : f32 to vector<1x8x128xf32>
    %32 = arith.select %28, %26, %31 : vector<1x8x128xi1>, vector<1x8x128xf32>
    %cst_26 = arith.constant dense<0.000000e+00> : vector<8x128xf32>
    %33 = vector.multi_reduction <add>, %32, %cst_26 [0] : vector<1x8x128xf32> to vector<8x128xf32>
    %34 = arith.addf %30, %33 : vector<8x128xf32>
    %c0_27 = arith.constant 0 : index
    %c0_28 = arith.constant 0 : index
    %c0_29 = arith.constant 0 : index
    %c0_30 = arith.constant 0 : index
    %35 = vector.load %arg6[%c0_27, %c0_28, %c0_29, %c0_30] : memref<1x3x8x128xf32, #tpu.memory_space<vmem>>, vector<1x1x8x128xf32>
    %36 = vector.shape_cast %35 : vector<1x1x8x128xf32> to vector<8x128xf32>
    %37 = vector.shape_cast %34 : vector<8x128xf32> to vector<1x1x8x128xf32>
    tpu.vector_store %arg6[%c0_27, %c0_28, %c0_29, %c0_30], %37 {strides = array<i32>} : memref<1x3x8x128xf32, #tpu.memory_space<vmem>>, vector<1x1x8x128xf32>,
    %c0_31 = arith.constant 0 : index
    %c0_32 = arith.constant 0 : index
    %c0_33 = arith.constant 0 : index
    %c0_34 = arith.constant 0 : index
    %38 = vector.load %arg7[%c0_31, %c0_32, %c0_33, %c0_34] : memref<1x3x8x128xf32, #tpu.memory_space<vmem>>, vector<1x1x8x128xf32>
    %39 = vector.shape_cast %38 : vector<1x1x8x128xf32> to vector<8x128xf32>
    %cst_35 = arith.constant dense<0.000000e+00> : vector<8x128xf32>
    %40 = vector.multi_reduction <add>, %26, %cst_35 [0] : vector<1x8x128xf32> to vector<8x128xf32>
    %41 = arith.addf %39, %40 : vector<8x128xf32>
    %c0_36 = arith.constant 0 : index
    %c0_37 = arith.constant 0 : index
    %c0_38 = arith.constant 0 : index
    %c0_39 = arith.constant 0 : index
    %42 = vector.load %arg7[%c0_36, %c0_37, %c0_38, %c0_39] : memref<1x3x8x128xf32, #tpu.memory_space<vmem>>, vector<1x1x8x128xf32>
    %43 = vector.shape_cast %42 : vector<1x1x8x128xf32> to vector<8x128xf32>
    %44 = vector.shape_cast %41 : vector<8x128xf32> to vector<1x1x8x128xf32>
    tpu.vector_store %arg7[%c0_36, %c0_37, %c0_38, %c0_39], %44 {strides = array<i32>} : memref<1x3x8x128xf32, #tpu.memory_space<vmem>>, vector<1x1x8x128xf32>,
    %c0_40 = arith.constant 0 : index
    %c0_41 = arith.constant 0 : index
    %c0_42 = arith.constant 0 : index
    %c0_43 = arith.constant 0 : index
    %45 = vector.load %arg8[%c0_40, %c0_41, %c0_42, %c0_43] : memref<1x3x8x128xf32, #tpu.memory_space<vmem>>, vector<1x1x8x128xf32>
    %46 = vector.shape_cast %45 : vector<1x1x8x128xf32> to vector<8x128xf32>
    %47 = arith.extui %28 : vector<1x8x128xi1> to vector<1x8x128xi32>
    %48 = arith.sitofp %47 : vector<1x8x128xi32> to vector<1x8x128xf32>
    %cst_44 = arith.constant dense<0.000000e+00> : vector<8x128xf32>
    %49 = vector.multi_reduction <add>, %48, %cst_44 [0] : vector<1x8x128xf32> to vector<8x128xf32>
    %50 = arith.addf %46, %49 : vector<8x128xf32>
    %c0_45 = arith.constant 0 : index
    %c0_46 = arith.constant 0 : index
    %c0_47 = arith.constant 0 : index
    %c0_48 = arith.constant 0 : index
    %51 = vector.load %arg8[%c0_45, %c0_46, %c0_47, %c0_48] : memref<1x3x8x128xf32, #tpu.memory_space<vmem>>, vector<1x1x8x128xf32>
    %52 = vector.shape_cast %51 : vector<1x1x8x128xf32> to vector<8x128xf32>
    %53 = vector.shape_cast %50 : vector<8x128xf32> to vector<1x1x8x128xf32>
    tpu.vector_store %arg8[%c0_45, %c0_46, %c0_47, %c0_48], %53 {strides = array<i32>} : memref<1x3x8x128xf32, #tpu.memory_space<vmem>>, vector<1x1x8x128xf32>,
    %54 = arith.mulf %14, %25 : vector<1x8x128xf32>
    %c2_i32 = arith.constant 2 : i32
    %55 = vector.broadcast %c2_i32 : i32 to vector<1x8x128xi32>
    %56 = arith.cmpi eq, %21, %55 : vector<1x8x128xi32>
    %c0_49 = arith.constant 0 : index
    %c1 = arith.constant 1 : index
    %c0_50 = arith.constant 0 : index
    %c0_51 = arith.constant 0 : index
    %57 = vector.load %arg6[%c0_49, %c1, %c0_50, %c0_51] : memref<1x3x8x128xf32, #tpu.memory_space<vmem>>, vector<1x1x8x128xf32>
    %58 = vector.shape_cast %57 : vector<1x1x8x128xf32> to vector<8x128xf32>
    %cst_52 = arith.constant 0.000000e+00 : f32
    %59 = vector.broadcast %cst_52 : f32 to vector<1x8x128xf32>
    %60 = arith.select %56, %54, %59 : vector<1x8x128xi1>, vector<1x8x128xf32>
    %cst_53 = arith.constant dense<0.000000e+00> : vector<8x128xf32>
    %61 = vector.multi_reduction <add>, %60, %cst_53 [0] : vector<1x8x128xf32> to vector<8x128xf32>
    %62 = arith.addf %58, %61 : vector<8x128xf32>
    %c0_54 = arith.constant 0 : index
    %c1_55 = arith.constant 1 : index
    %c0_56 = arith.constant 0 : index
    %c0_57 = arith.constant 0 : index
    %63 = vector.load %arg6[%c0_54, %c1_55, %c0_56, %c0_57] : memref<1x3x8x128xf32, #tpu.memory_space<vmem>>, vector<1x1x8x128xf32>
    %64 = vector.shape_cast %63 : vector<1x1x8x128xf32> to vector<8x128xf32>
    %65 = vector.shape_cast %62 : vector<8x128xf32> to vector<1x1x8x128xf32>
    tpu.vector_store %arg6[%c0_54, %c1_55, %c0_56, %c0_57], %65 {strides = array<i32>} : memref<1x3x8x128xf32, #tpu.memory_space<vmem>>, vector<1x1x8x128xf32>,
    %c0_58 = arith.constant 0 : index
    %c1_59 = arith.constant 1 : index
    %c0_60 = arith.constant 0 : index
    %c0_61 = arith.constant 0 : index
    %66 = vector.load %arg7[%c0_58, %c1_59, %c0_60, %c0_61] : memref<1x3x8x128xf32, #tpu.memory_space<vmem>>, vector<1x1x8x128xf32>
    %67 = vector.shape_cast %66 : vector<1x1x8x128xf32> to vector<8x128xf32>
    %cst_62 = arith.constant dense<0.000000e+00> : vector<8x128xf32>
    %68 = vector.multi_reduction <add>, %54, %cst_62 [0] : vector<1x8x128xf32> to vector<8x128xf32>
    %69 = arith.addf %67, %68 : vector<8x128xf32>
    %c0_63 = arith.constant 0 : index
    %c1_64 = arith.constant 1 : index
    %c0_65 = arith.constant 0 : index
    %c0_66 = arith.constant 0 : index
    %70 = vector.load %arg7[%c0_63, %c1_64, %c0_65, %c0_66] : memref<1x3x8x128xf32, #tpu.memory_space<vmem>>, vector<1x1x8x128xf32>
    %71 = vector.shape_cast %70 : vector<1x1x8x128xf32> to vector<8x128xf32>
    %72 = vector.shape_cast %69 : vector<8x128xf32> to vector<1x1x8x128xf32>
    tpu.vector_store %arg7[%c0_63, %c1_64, %c0_65, %c0_66], %72 {strides = array<i32>} : memref<1x3x8x128xf32, #tpu.memory_space<vmem>>, vector<1x1x8x128xf32>,
    %c0_67 = arith.constant 0 : index
    %c1_68 = arith.constant 1 : index
    %c0_69 = arith.constant 0 : index
    %c0_70 = arith.constant 0 : index
    %73 = vector.load %arg8[%c0_67, %c1_68, %c0_69, %c0_70] : memref<1x3x8x128xf32, #tpu.memory_space<vmem>>, vector<1x1x8x128xf32>
    %74 = vector.shape_cast %73 : vector<1x1x8x128xf32> to vector<8x128xf32>
    %75 = arith.extui %56 : vector<1x8x128xi1> to vector<1x8x128xi32>
    %76 = arith.sitofp %75 : vector<1x8x128xi32> to vector<1x8x128xf32>
    %cst_71 = arith.constant dense<0.000000e+00> : vector<8x128xf32>
    %77 = vector.multi_reduction <add>, %76, %cst_71 [0] : vector<1x8x128xf32> to vector<8x128xf32>
    %78 = arith.addf %74, %77 : vector<8x128xf32>
    %c0_72 = arith.constant 0 : index
    %c1_73 = arith.constant 1 : index
    %c0_74 = arith.constant 0 : index
    %c0_75 = arith.constant 0 : index
    %79 = vector.load %arg8[%c0_72, %c1_73, %c0_74, %c0_75] : memref<1x3x8x128xf32, #tpu.memory_space<vmem>>, vector<1x1x8x128xf32>
    %80 = vector.shape_cast %79 : vector<1x1x8x128xf32> to vector<8x128xf32>
    %81 = vector.shape_cast %78 : vector<8x128xf32> to vector<1x1x8x128xf32>
    tpu.vector_store %arg8[%c0_72, %c1_73, %c0_74, %c0_75], %81 {strides = array<i32>} : memref<1x3x8x128xf32, #tpu.memory_space<vmem>>, vector<1x1x8x128xf32>,
    %82 = arith.mulf %16, %25 : vector<1x8x128xf32>
    %c3_i32 = arith.constant 3 : i32
    %83 = vector.broadcast %c3_i32 : i32 to vector<1x8x128xi32>
    %84 = arith.cmpi eq, %21, %83 : vector<1x8x128xi32>
    %c0_76 = arith.constant 0 : index
    %c2 = arith.constant 2 : index
    %c0_77 = arith.constant 0 : index
    %c0_78 = arith.constant 0 : index
    %85 = vector.load %arg6[%c0_76, %c2, %c0_77, %c0_78] : memref<1x3x8x128xf32, #tpu.memory_space<vmem>>, vector<1x1x8x128xf32>
    %86 = vector.shape_cast %85 : vector<1x1x8x128xf32> to vector<8x128xf32>
    %cst_79 = arith.constant 0.000000e+00 : f32
    %87 = vector.broadcast %cst_79 : f32 to vector<1x8x128xf32>
    %88 = arith.select %84, %82, %87 : vector<1x8x128xi1>, vector<1x8x128xf32>
    %cst_80 = arith.constant dense<0.000000e+00> : vector<8x128xf32>
    %89 = vector.multi_reduction <add>, %88, %cst_80 [0] : vector<1x8x128xf32> to vector<8x128xf32>
    %90 = arith.addf %86, %89 : vector<8x128xf32>
    %c0_81 = arith.constant 0 : index
    %c2_82 = arith.constant 2 : index
    %c0_83 = arith.constant 0 : index
    %c0_84 = arith.constant 0 : index
    %91 = vector.load %arg6[%c0_81, %c2_82, %c0_83, %c0_84] : memref<1x3x8x128xf32, #tpu.memory_space<vmem>>, vector<1x1x8x128xf32>
    %92 = vector.shape_cast %91 : vector<1x1x8x128xf32> to vector<8x128xf32>
    %93 = vector.shape_cast %90 : vector<8x128xf32> to vector<1x1x8x128xf32>
    tpu.vector_store %arg6[%c0_81, %c2_82, %c0_83, %c0_84], %93 {strides = array<i32>} : memref<1x3x8x128xf32, #tpu.memory_space<vmem>>, vector<1x1x8x128xf32>,
    %c0_85 = arith.constant 0 : index
    %c2_86 = arith.constant 2 : index
    %c0_87 = arith.constant 0 : index
    %c0_88 = arith.constant 0 : index
    %94 = vector.load %arg7[%c0_85, %c2_86, %c0_87, %c0_88] : memref<1x3x8x128xf32, #tpu.memory_space<vmem>>, vector<1x1x8x128xf32>
    %95 = vector.shape_cast %94 : vector<1x1x8x128xf32> to vector<8x128xf32>
    %cst_89 = arith.constant dense<0.000000e+00> : vector<8x128xf32>
    %96 = vector.multi_reduction <add>, %82, %cst_89 [0] : vector<1x8x128xf32> to vector<8x128xf32>
    %97 = arith.addf %95, %96 : vector<8x128xf32>
    %c0_90 = arith.constant 0 : index
    %c2_91 = arith.constant 2 : index
    %c0_92 = arith.constant 0 : index
    %c0_93 = arith.constant 0 : index
    %98 = vector.load %arg7[%c0_90, %c2_91, %c0_92, %c0_93] : memref<1x3x8x128xf32, #tpu.memory_space<vmem>>, vector<1x1x8x128xf32>
    %99 = vector.shape_cast %98 : vector<1x1x8x128xf32> to vector<8x128xf32>
    %100 = vector.shape_cast %97 : vector<8x128xf32> to vector<1x1x8x128xf32>
    tpu.vector_store %arg7[%c0_90, %c2_91, %c0_92, %c0_93], %100 {strides = array<i32>} : memref<1x3x8x128xf32, #tpu.memory_space<vmem>>, vector<1x1x8x128xf32>,
    %c0_94 = arith.constant 0 : index
    %c2_95 = arith.constant 2 : index
    %c0_96 = arith.constant 0 : index
    %c0_97 = arith.constant 0 : index
    %101 = vector.load %arg8[%c0_94, %c2_95, %c0_96, %c0_97] : memref<1x3x8x128xf32, #tpu.memory_space<vmem>>, vector<1x1x8x128xf32>
    %102 = vector.shape_cast %101 : vector<1x1x8x128xf32> to vector<8x128xf32>
    %103 = arith.extui %84 : vector<1x8x128xi1> to vector<1x8x128xi32>
    %104 = arith.sitofp %103 : vector<1x8x128xi32> to vector<1x8x128xf32>
    %cst_98 = arith.constant dense<0.000000e+00> : vector<8x128xf32>
    %105 = vector.multi_reduction <add>, %104, %cst_98 [0] : vector<1x8x128xf32> to vector<8x128xf32>
    %106 = arith.addf %102, %105 : vector<8x128xf32>
    %c0_99 = arith.constant 0 : index
    %c2_100 = arith.constant 2 : index
    %c0_101 = arith.constant 0 : index
    %c0_102 = arith.constant 0 : index
    %107 = vector.load %arg8[%c0_99, %c2_100, %c0_101, %c0_102] : memref<1x3x8x128xf32, #tpu.memory_space<vmem>>, vector<1x1x8x128xf32>
    %108 = vector.shape_cast %107 : vector<1x1x8x128xf32> to vector<8x128xf32>
    %109 = vector.shape_cast %106 : vector<8x128xf32> to vector<1x1x8x128xf32>
    tpu.vector_store %arg8[%c0_99, %c2_100, %c0_101, %c0_102], %109 {strides = array<i32>} : memref<1x3x8x128xf32, #tpu.memory_space<vmem>>, vector<1x1x8x128xf32>,
    return
  }
  func.func @transform_0(%arg0: i32, %arg1: i32) -> (i32, i32, i32, i32, i32) {
    %c1_i32 = arith.constant 1 : i32
    %c0_i32 = arith.constant 0 : i32
    %c0_i32_0 = arith.constant 0 : i32
    %c0_i32_1 = arith.constant 0 : i32
    return %arg0, %c1_i32, %arg1, %c0_i32, %c0_i32_0 : i32, i32, i32, i32, i32
  }
  func.func @transform_1(%arg0: i32, %arg1: i32) -> (i32, i32, i32, i32, i32) {
    %c2_i32 = arith.constant 2 : i32
    %c0_i32 = arith.constant 0 : i32
    %c0_i32_0 = arith.constant 0 : i32
    %c0_i32_1 = arith.constant 0 : i32
    return %arg0, %c2_i32, %arg1, %c0_i32, %c0_i32_0 : i32, i32, i32, i32, i32
  }
  func.func @transform_2(%arg0: i32, %arg1: i32) -> (i32, i32, i32, i32, i32) {
    %c3_i32 = arith.constant 3 : i32
    %c0_i32 = arith.constant 0 : i32
    %c0_i32_0 = arith.constant 0 : i32
    %c0_i32_1 = arith.constant 0 : i32
    return %arg0, %c3_i32, %arg1, %c0_i32, %c0_i32_0 : i32, i32, i32, i32, i32
  }
  func.func @transform_3(%arg0: i32, %arg1: i32) -> (i32, i32, i32, i32, i32) {
    %c0_i32 = arith.constant 0 : i32
    %c0_i32_0 = arith.constant 0 : i32
    %c0_i32_1 = arith.constant 0 : i32
    %c0_i32_2 = arith.constant 0 : i32
    return %arg0, %c0_i32, %arg1, %c0_i32_0, %c0_i32_1 : i32, i32, i32, i32, i32
  }
  func.func @transform_4(%arg0: i32, %arg1: i32) -> (i32, i32, i32, i32) {
    %c0_i32 = arith.constant 0 : i32
    %c0_i32_0 = arith.constant 0 : i32
    %c0_i32_1 = arith.constant 0 : i32
    %c0_i32_2 = arith.constant 0 : i32
    return %arg0, %c0_i32, %c0_i32_0, %c0_i32_1 : i32, i32, i32, i32
  }
  func.func @transform_5(%arg0: i32, %arg1: i32) -> (i32, i32, i32, i32) {
    %c0_i32 = arith.constant 0 : i32
    %c0_i32_0 = arith.constant 0 : i32
    %c0_i32_1 = arith.constant 0 : i32
    %c0_i32_2 = arith.constant 0 : i32
    return %arg0, %c0_i32, %c0_i32_0, %c0_i32_1 : i32, i32, i32, i32
  }
  func.func @transform_6(%arg0: i32, %arg1: i32) -> (i32, i32, i32, i32) {
    %c0_i32 = arith.constant 0 : i32
    %c0_i32_0 = arith.constant 0 : i32
    %c0_i32_1 = arith.constant 0 : i32
    %c0_i32_2 = arith.constant 0 : i32
    return %arg0, %c0_i32, %c0_i32_0, %c0_i32_1 : i32, i32, i32, i32
  }
}

</mosaic_0001>

<bundles_post_ra>
// kernel: tpu_custom_call.1
= control target key start
LH: loop header
LB: loop body
LE: loop exit
PB: predicated region body
PF: predicated region fallthrough
CT: control target
= control target key end

     0   :  { %s1632_s0 = inlined_call_operand.hbm [shape: f32[2,4,1,8,128], index: 0, kind: input, shape index: {}]   ;;  %s1633_s1 = inlined_call_operand.hbm [shape: f32[2,4,1,8,128], index: 1, kind: input, shape index: {}]   ;;  %s1634_s2 = inlined_call_operand.hbm [shape: f32[2,4,1,8,128], index: 2, kind: input, shape index: {}]   ;;  %s1635_s3 = inlined_call_operand.hbm [shape: s32[2,1,1,8,128], index: 3, kind: input, shape index: {}]   ;;  %s1636_s4 = inlined_call_operand.hbm [shape: f32[2,3,8,128], index: 4, kind: output, shape index: {0}]   ;;  %s1637_s5 = inlined_call_operand.hbm [shape: f32[2,3,8,128], index: 5, kind: output, shape index: {1}]   ;;  %s1638_s6 = inlined_call_operand.hbm [shape: f32[2,3,8,128], index: 6, kind: output, shape index: {2}]  }
   0x1   :  { %1650 = sst [smem:[#allocation25_spill]] %s1633_s1 }
   0x2   :  { %12 = vsyncpa [#allocation3], 0 }
   0x3   :  { %14 = vsyncpa [#allocation3 + $0x1], 0 }
   0x4   :  { %15 = vsyncpa [#allocation6], 0 }
   0x5   :  { %17 = vsyncpa [#allocation6 + $0x1], 0 }
   0x6   :  { %18 = vsyncpa [#allocation9], 0 }
   0x7   :  { %20 = vsyncpa [#allocation9 + $0x1], 0 }
   0x8   :  { %21 = vsyncpa [#allocation4], 0 }
   0x9   :  { %23 = vsyncpa [#allocation4 + $0x1], 0 }
   0xa   :  { %24 = vsyncpa [#allocation12], 0 }
   0xb   :  { %26 = vsyncpa [#allocation12 + $0x1], 0  ;;  %s1252_s21 = smov 0   ;;  %s1254_s22 = smov 0  }
   0xc   :  { %s1256_s23 = smov 0   ;;  %s1258_s24 = smov 0  }
   0xd   :  { %s1260_s25 = smov 0   ;;  %s1262_s26 = smov 0  }
   0xe LB: > { %1651 = sst [smem:[#allocation19_spill]] %s1185_s21  ;;  %s1283_s27 = sadd.s32 4294967295, %s1205_s26   ;;  %s1205_s26 = sphi %s1262_s26, %s32_s26   ;;  %s1201_s25 = sphi %s1260_s25, %s1684_s25   ;;  %s1197_s24 = sphi %s1258_s24, %s1683_s24   ;;  %s1193_s23 = sphi %s1256_s23, %s1679_s23   ;;  %s1189_s22 = sphi %s1254_s22, %s1682_s22   ;;  %s1185_s21 = sphi %s1252_s21, %s1681_s21  }
   0xf   : > { %1652 = sst [smem:[#allocation20_spill]] %s1193_s23  ;;  %s1639_s28 = sadd.s32 4294967294, %s1205_s26  }
  0x10   : > { %1653 = sst [smem:[#allocation21_spill]] %s1205_s26  ;;  %s44_s29 = sadd.s32 1, %s1201_s25 }
  0x11   : > { %s53_s30 = sadd.s32 1, %s1193_s23  ;;  %p46_p0 = scmp.ge.s32.totalorder %s44_s29, 2 }
  0x12   : > { %p60_p1 = scmp.ne.s32.totalorder %s1193_s23, %s1189_s22  ;;  %p61_p2 = scmp.eq.s32.totalorder %s1205_s26, 0 }
  0x13   : > { %p66_p3 = scmp.ne.s32.totalorder %s1189_s22, %s1185_s21  ;;  %s1686_s29 = smov (%p46_p0, %s44_s29), 0 }
  0x14   : > { %1654 = sst [smem:[#allocation22_spill]] %s1686_s29  ;;  %p1295_p4 = por %p61_p2, %p60_p1 }
  0x15   : > { %p67_p5 = scmp.eq.s32.totalorder %s1283_s27, 0  ;;  %s48_s8 = ssub.s32 %s1201_s25, %s1686_s29 }
  0x16   : > { %p174_p6 = scmp.eq.s32.totalorder %s1283_s27, 1  ;;  %p51_p7 = scmp.eq.s32.totalorder %s48_s8, 0 }
  0x17   : > { %p1303_p8 = por %p67_p5, %p66_p3  ;;  %p180_p10 = scmp.eq.s32.totalorder %s1639_s28, 1 }
  0x18   : > { %p1307_p9 = por %p174_p6, %p60_p1  ;;  %p871_p13 = scmp.lt.s32.totalorder %s1205_s26, 2 }
  0x19   : > { %s1656_s9 = scalar_select %p1303_p8, 1, 0 }
  0x1a   : > { %s1657_s10 = scalar_select %p1307_p9, 1, 0 }
  0x1b   : > { %s1314_s11 = scalar_select %p51_p7, %s1193_s23, %s53_s30  }
  0x1c   : > { %p1316_p11 = por %p180_p10, %p66_p3  ;;  %s1323_s13 = sand.u32 1, %s1193_s23  }
  0x1d   : > { %1658 = sst [smem:[#allocation23_spill]] %s1314_s11  ;;  %s1326_s14 = sshll.u32 %s1323_s13, 3 }
  0x1e   : > { %s1659_s12 = scalar_select %p1316_p11, 1, 0 }
  0x1f   : > { %s1329_s15 = sshll.u32 %s1201_s25, 9  ;;  %p1333_p0 = pnand %p871_p13, %p1295_p4 }
  0x20   : > { %1660 = sst [smem:[#allocation24_spill]] %s1659_s12  ;;  %s273_s17 = sand.u32 1, %s1205_s26  }
  0x21   : > { %s1661_s16 = scalar_select %p1333_p0, 1, 0 }
  0x22   : > { %s1662_s1 = sld [smem:[#allocation25_spill]]  ;;  %s277_s8 = scalar_lea.vmem [#allocation5], %s1326_s14 }
  0x23   : > { %s287_s28 = sshll.u32 %s277_s8, 4  ;;  %s1348_s7 = scalar_lea.sflag [#allocation6], %s273_s17  ;;  %s1345_s28 = int_to_ptr.vmem [resolvable:$true] %s287_s28 }
  0x24   : > { %p1353_p3 = pneg %p1333_p0 }
  0x28   : > { %s637_s20 = scalar_lea.hbm %s1662_s1, %s1329_s15  ;;  %s937_s8 = scalar_lea.hbm %s1662_s1, 1024 }
  0x29   : > { %s1342_s30 = scalar_lea.hbm %s637_s20, 256  ;;  %s962_s29 = scalar_lea.hbm %s637_s20, 384 }
  0x2a   : > { %p933_p2 = scmp.ne.s32.totalorder %s1342_s30, %s962_s29  ;;  %p938_p6 = scmp.lt.u32.totalorder %s1342_s30, %s1662_s1 }
  0x2b   : > { %p939_p7 = scmp.lt.u32.totalorder %s937_s8, %s962_s29  ;;  %p941_p13 = scmp.lt.u32.totalorder %s962_s29, %s1342_s30 }
  0x2c   : > { %p935_p4 = pnand %p1353_p3, %p933_p2 }
  0x2d   : > { %p940_p10 = por %p939_p7, %p938_p6 }
  0x2e   : > { %p936_p5 = pneg %p935_p4 }
  0x2f   : > { %p942_p12 = por %p941_p13, %p940_p10 }
  0x31   : > { %p943_p1 = pnand %p942_p12, %p936_p5 }
  0x33   : > { %946 = shalt.err (!%p943_p1)
}
  0x34   : > { %s947_s17 = scalar_lea.vmem %s1345_s28, 128  ;;  %s1207_s20 = smov [#allocation5]  }
  0x35   : > { %p948_p2 = scmp.ne.s32.totalorder %s1345_s28, %s947_s17  ;;  %s952_s18 = sshll.u32 %s1207_s20, 4  ;;  %s953_s18 = int_to_ptr.vmem [resolvable:$false] %s952_s18 }
  0x36   : > { %s954_s23 = scalar_lea.vmem %s953_s18, 256  ;;  %p955_p9 = scmp.lt.s32.totalorder %s1345_s28, %s953_s18 }
  0x37   : > { %p950_p4 = pnand %p948_p2, %p1353_p3  ;;  %p956_p8 = scmp.lt.s32.totalorder %s954_s23, %s947_s17 }
  0x39   : > { %p951_p11 = pneg %p950_p4  ;;  %p957_p6 = por %p956_p8, %p955_p9 }
  0x3b   : > { %p958_p7 = pnand %p957_p6, %p951_p11 }
  0x3d   : > { %961 = shalt.err (!%p958_p7)
}
  0x3e   : > { %854 = dma.hbm_to_vmem [thread:$0]  (!%p1333_p0), %s1342_s30, 128, %s1345_s28, %s1348_s7  }
  0x3f   : > { %p332_p12 = scmp.lt.s32.totalorder %s1205_s26, 3  ;;  %p1664_p1 = scmp.ge.s32.totalorder %s1205_s26, 1 }
  0x40   : > { %s629_s8 = scalar_lea.hbm %s1632_s0, %s1329_s15  ;;  %s256_s17 = scalar_lea.vmem [#allocation2], %s1326_s14 }
  0x41   : > { %p1380_p5 = pnand %p1664_p1, %p332_p12  ;;  %s266_s20 = sshll.u32 %s256_s17, 4  ;;  %s267_s20 = int_to_ptr.vmem [resolvable:$true] %s266_s20 }
  0x42   : > { %s1389_s18 = scalar_lea.hbm %s629_s8, 128  ;;  %s253_s23 = scalar_lea.sflag [#allocation3], %s1323_s13 }
  0x43   : > { %s1665_s29 = scalar_select %p1380_p5, 1, 0 }
  0x44   : > { %s993_s28 = scalar_lea.hbm %s629_s8, 256  ;;  %s968_s26 = scalar_lea.hbm %s1632_s0, 1024 }
  0x45   : > { %p964_p8 = scmp.ne.s32.totalorder %s1389_s18, %s993_s28  ;;  %p969_p10 = scmp.lt.u32.totalorder %s1389_s18, %s1632_s0 }
  0x46   : > { %p970_p13 = scmp.lt.u32.totalorder %s968_s26, %s993_s28  ;;  %p972_p4 = scmp.lt.u32.totalorder %s993_s28, %s1389_s18 }
  0x47   : > { %p966_p9 = pnand %p964_p8, %p1353_p3 }
  0x48   : > { %p971_p2 = por %p970_p13, %p969_p10 }
  0x49   : > { %p967_p11 = pneg %p966_p9 }
  0x4a   : > { %p973_p6 = por %p972_p4, %p971_p2 }
  0x4c   : > { %p974_p7 = pnand %p973_p6, %p967_p11 }
  0x4e   : > { %977 = shalt.err (!%p974_p7)
}
  0x4f   : > { %s978_s17 = scalar_lea.vmem %s267_s20, 128  ;;  %s1208_s8 = smov [#allocation2]  }
  0x50   : > { %p979_p12 = scmp.ne.s32.totalorder %s267_s20, %s978_s17  ;;  %s983_s21 = sshll.u32 %s1208_s8, 4  ;;  %s984_s21 = int_to_ptr.vmem [resolvable:$false] %s983_s21 }
  0x51   : > { %s985_s1 = scalar_lea.vmem %s984_s21, 256  ;;  %p986_p9 = scmp.lt.s32.totalorder %s267_s20, %s984_s21 }
  0x52   : > { %p981_p1 = pnand %p979_p12, %p1353_p3  ;;  %p987_p5 = scmp.lt.s32.totalorder %s985_s1, %s978_s17 }
  0x54   : > { %p982_p8 = pneg %p981_p1  ;;  %p988_p0 = por %p987_p5, %p986_p9 }
  0x56   : > { %p989_p10 = pnand %p988_p0, %p982_p8 }
  0x58   : > { %992 = shalt.err (!%p989_p10)
}
  0x59   : > { %p1666_p13 = scmp.ne.s32.totalorder %s1661_s16, 0  ;;  %s645_s30 = scalar_lea.hbm %s1634_s2, %s1329_s15 }
  0x5a   : > { %s1412_s12 = scalar_lea.hbm %s645_s30, 384  ;;  %s298_s21 = scalar_lea.vmem [#allocation7], %s1326_s14 }
  0x5b   : > { %851 = dma.hbm_to_vmem [thread:$0]  (!%p1666_p13), %s1389_s18, 128, %s267_s20, %s253_s23  }
  0x5c   : > { %s308_s19 = sshll.u32 %s298_s21, 4  ;;  %s1024_s17 = scalar_lea.hbm %s645_s30, 512  ;;  %s309_s19 = int_to_ptr.vmem [resolvable:$true] %s308_s19 }
  0x5d   : > { %p995_p0 = scmp.ne.s32.totalorder %s1412_s12, %s1024_s17  ;;  %s999_s20 = scalar_lea.hbm %s1634_s2, 1024 }
  0x5e   : > { %p1000_p2 = scmp.lt.u32.totalorder %s1412_s12, %s1634_s2  ;;  %p1001_p4 = scmp.lt.u32.totalorder %s999_s20, %s1024_s17 }
  0x5f   : > { %p997_p5 = pnand %p995_p0, %p1353_p3  ;;  %p1003_p7 = scmp.lt.u32.totalorder %s1024_s17, %s1412_s12 }
  0x60   : > { %p1002_p6 = por %p1001_p4, %p1000_p2 }
  0x61   : > { %p998_p11 = pneg %p997_p5 }
  0x62   : > { %p1004_p12 = por %p1003_p7, %p1002_p6 }
  0x64   : > { %p1005_p1 = pnand %p1004_p12, %p998_p11 }
  0x66   : > { %1008 = shalt.err (!%p1005_p1)
}
  0x67   : > { %s1009_s15 = scalar_lea.vmem %s309_s19, 128  ;;  %s1209_s26 = smov [#allocation7]  }
  0x68   : > { %p1010_p8 = scmp.ne.s32.totalorder %s309_s19, %s1009_s15  ;;  %s1014_s28 = sshll.u32 %s1209_s26, 4  ;;  %s1015_s28 = int_to_ptr.vmem [resolvable:$false] %s1014_s28 }
  0x69   : > { %s1016_s30 = scalar_lea.vmem %s1015_s28, 256  ;;  %p1017_p0 = scmp.lt.s32.totalorder %s309_s19, %s1015_s28 }
  0x6a   : > { %p1012_p9 = pnand %p1010_p8, %p1353_p3  ;;  %p1018_p5 = scmp.lt.s32.totalorder %s1016_s30, %s1009_s15 }
  0x6c   : > { %p1013_p10 = pneg %p1012_p9  ;;  %p1019_p13 = por %p1018_p5, %p1017_p0 }
  0x6e   : > { %p1020_p2 = pnand %p1019_p13, %p1013_p10 }
  0x70   : > { %1023 = shalt.err (!%p1020_p2)
}
  0x71   : > { %p1667_p4 = scmp.ne.s32.totalorder %s1661_s16, 0  ;;  %s801_s21 = sshll.u32 %s1201_s25, 7 }
  0x72   : > { %s1436_s1 = scalar_lea.hbm %s1635_s3, %s801_s21  ;;  %s319_s20 = scalar_lea.vmem [#allocation8], %s1326_s14 }
  0x73   : > { %857 = dma.hbm_to_vmem [thread:$0]  (!%p1667_p4), %s1412_s12, 128, %s309_s19, %s1348_s7  }
  0x74   : > { %s327_s18 = sshll.u32 %s319_s20, 4  ;;  %s316_s23 = scalar_lea.sflag [#allocation9], %s1323_s13  ;;  %s328_s18 = int_to_ptr.vmem [resolvable:$true] %s327_s18 }
  0x75   : > { %s1025_s15 = scalar_lea.hbm %s1436_s1, 128  ;;  %s1030_s19 = scalar_lea.hbm %s1635_s3, 256 }
  0x76   : > { %p1026_p13 = scmp.ne.s32.totalorder %s1436_s1, %s1025_s15  ;;  %p1031_p7 = scmp.lt.u32.totalorder %s1436_s1, %s1635_s3 }
  0x77   : > { %p1032_p12 = scmp.lt.u32.totalorder %s1030_s19, %s1025_s15  ;;  %p1034_p8 = scmp.lt.u32.totalorder %s1025_s15, %s1436_s1 }
  0x78   : > { %p1028_p11 = pnand %p1026_p13, %p1353_p3 }
  0x79   : > { %p1033_p1 = por %p1032_p12, %p1031_p7 }
  0x7a   : > { %p1029_p6 = pneg %p1028_p11 }
  0x7b   : > { %p1035_p9 = por %p1034_p8, %p1033_p1 }
  0x7d   : > { %p1036_p10 = pnand %p1035_p9, %p1029_p6 }
  0x7f   : > { %1039 = shalt.err (!%p1036_p10)
}
  0x80   : > { %s1040_s13 = scalar_lea.vmem %s328_s18, 128  ;;  %s1210_s14 = smov [#allocation8]  }
  0x81   : > { %p1041_p0 = scmp.ne.s32.totalorder %s328_s18, %s1040_s13  ;;  %s1045_s30 = sshll.u32 %s1210_s14, 4  ;;  %s1046_s30 = int_to_ptr.vmem [resolvable:$false] %s1045_s30 }
  0x82   : > { %s1047_s21 = scalar_lea.vmem %s1046_s30, 256  ;;  %p1048_p13 = scmp.lt.s32.totalorder %s328_s18, %s1046_s30 }
  0x83   : > { %p1043_p5 = pnand %p1041_p0, %p1353_p3  ;;  %p1049_p11 = scmp.lt.s32.totalorder %s1047_s21, %s1040_s13 }
  0x85   : > { %p1044_p2 = pneg %p1043_p5  ;;  %p1050_p4 = por %p1049_p11, %p1048_p13 }
  0x87   : > { %p1051_p7 = pnand %p1050_p4, %p1044_p2 }
  0x89   : > { %1054 = shalt.err (!%p1051_p7)
}
  0x8a   : > { %p1668_p12 = scmp.ne.s32.totalorder %s1661_s16, 0  ;;  %p1669_p6 = scmp.ne.s32.totalorder %s1665_s29, 0 }
  0x8b   : > { %s1460_s11 = sand.u32 (!%p1669_p6), 1, %s1189_s22   ;;  %p1670_p3 = scmp.ne.s32.totalorder (!%p1669_p6), %s1656_s9, 0 }
  0x8c   : > { %860 = dma.hbm_to_vmem [thread:$0]  (!%p1668_p12), %s1436_s1, 128, %s328_s18, %s316_s23  }
  0x8d   : > { %336 = sbr.rel (%p1669_p6) target bundleno = 261 (0x105), region = 36  ;;  %s803_s17 = sshll.u32 (!%p1669_p6), %s1460_s11, 3 }
  0x8e   : > { %s339_s8 = scalar_lea.sflag (!%p1669_p6), [#allocation3], %s1460_s11  ;;  %s342_s20 = scalar_lea.vmem (!%p1669_p6), [#allocation2], %s803_s17 }
  0x94   : > { %1164 = dma.done.wait (%p1670_p3), %s339_s8, 128  }
  0x95   : > { %1166 = vsyncadd (%p1670_p3), %s339_s8, 4294967168  ;;  %s347_s16 = sand.u32 1, %s1283_s27   ;;  %s351_s1 = scalar_lea.vmem [#allocation5], %s803_s17 }
  0x96   : > { %s348_s29 = scalar_lea.sflag [#allocation6], %s347_s16 }
  0x97   : > { %1168 = dma.done.wait (%p1670_p3), %s348_s29, 256  }
  0x98   : > { %1170 = vsyncadd (%p1670_p3), %s348_s29, 4294967040  ;;  %s360_s18 = scalar_lea.vmem [#allocation7], %s803_s17  ;;  %s366_s23 = scalar_lea.sflag [#allocation9], %s1460_s11 }
  0x99   : > { %s369_s15 = scalar_lea.vmem [#allocation8], %s803_s17 }
  0x9a   : > { %1172 = dma.done.wait (%p1670_p3), %s366_s23, 128  }
  0x9b   : > { %1174 = vsyncadd (%p1670_p3), %s366_s23, 4294967168  ;;  %s1481_s7 = smul.u32 24, %s1460_s11  ;;  %v436_v0 = vld [vmem:[%s342_s20] sm:$0xff]  ;;  %v437_v1 = vld [vmem:[%s351_s1] sm:$0xff]  ;;  %v1211_v6 = vmov 0.0   ;;  %s1526_s23 = scalar_lea.sflag [#allocation12], %s347_s16 }
  0x9c   : > { %v438_v2 = vld [vmem:[%s360_s18] sm:$0xff]  ;;  %v439_v3 = vmax.f32 %v436_v0, %v437_v1  ;;  %v453_v4 = vld [vmem:[%s369_s15] sm:$0xff]  ;;  %s831_s12 = smul.u32 384, %s1197_s24  ;;  %p1671_p1 = scmp.ne.s32.totalorder %s1657_s10, 0 }
  0x9d   : > { %vm457_vm0 = vcmp.eq.s32.totalorder %v453_v4, 1  ;;  %vm474_vm1 = vcmp.eq.s32.totalorder %v453_v4, 2  ;;  %vm494_vm2 = vcmp.eq.s32.totalorder %v453_v4, 3  ;;  %s1487_s9 = scalar_lea.vmem [#allocation13], %s1481_s7  ;;  %vm454_vm3 = vcmp.ge.s32.totalorder %v453_v4, 0  ;;  %s415_s19 = scalar_lea.vmem [#allocation11], %s1481_s7 }
  0x9e   : > { %v440_v5 = vmax.f32 %v439_v3, %v438_v2  ;;  %v807_v7 = vsel %vm457_vm0, 1.0, %v1211_v6  ;;  %v813_v8 = vsel %vm474_vm1, 1.0, %v1211_v6  ;;  %v820_v9 = vsel %vm494_vm2, 1.0, %v1211_v6  ;;  %s553_s26 = sshll.u32 %s415_s19, 4  ;;  %s569_s28 = sshll.u32 %s1487_s9, 4  ;;  %s1505_s26 = int_to_ptr.vmem [resolvable:$true] %s553_s26  ;;  %s1514_s28 = int_to_ptr.vmem [resolvable:$true] %s569_s28 }
  0x9f   : > { %472 = vst [vmem:[%s1487_s9] sm:$0xff] %v807_v7  ;;  %814 = vst [vmem:[%s1487_s9 + $0x8] sm:$0xff] %v813_v8  ;;  %s1498_s30 = scalar_lea.hbm %s1637_s5, %s831_s12  ;;  %s1501_s21 = scalar_lea.vmem [#allocation10], %s1481_s7 }
  0xa0   : > { %v441_v10 = vsub.f32 %v436_v0, %v440_v5  ;;  %v444_v11 = vsub.f32 %v437_v1, %v440_v5  ;;  %v447_v12 = vsub.f32 %v438_v2, %v440_v5  ;;  %821 = vst [vmem:[%s1487_s9 + $0x10] sm:$0xff] %v820_v9  ;;  %s537_s17 = sshll.u32 %s1501_s21, 4  ;;  %s1512_s20 = scalar_lea.hbm %s1638_s6, %s831_s12  ;;  %s1521_s17 = int_to_ptr.vmem [resolvable:$true] %s537_s17 }
  0xa1   : > { %s1519_s18 = scalar_lea.hbm %s1636_s4, %s831_s12  ;;  %s1055_s15 = scalar_lea.vmem %s1505_s26, 384 }
  0xa2   : > { %v442_v13 = vmul.f32 1.442695, %v441_v10  ;;  %v445_v14 = vmul.f32 1.442695, %v444_v11  ;;  %v448_v15 = vmul.f32 1.442695, %v447_v12  ;;  %p1056_p4 = scmp.ne.s32.totalorder %s1505_s26, %s1055_s15 }
  0xa3   : > { %s1212_s7 = smov [#allocation11]  }
  0xa4   : > { %924 = vpow2.f32 %v442_v13  ;;  %p1057_p8 = pnand %p1056_p4, %p1671_p1  ;;  %s1059_s9 = sshll.u32 %s1212_s7, 4  ;;  %s1060_s9 = int_to_ptr.vmem [resolvable:$false] %s1059_s9 }
  0xa5   : > { %926 = vpow2.f32 %v445_v14  ;;  %p1062_p10 = scmp.lt.s32.totalorder %s1505_s26, %s1060_s9 }
  0xa6   : > { %928 = vpow2.f32 %v448_v15  ;;  %p1058_p9 = pneg %p1057_p8 }
  0xae   : > { %v925_v16 = vpop.eup %924 }
  0xaf   : > { %v927_v17 = vpop.eup %926 }
  0xb0   : > { %v929_v18 = vpop.eup %928  ;;  %v450_v19 = vadd.f32 %v927_v17, %v925_v16 }
  0xb2   : > { %v451_v20 = vadd.f32 %v929_v18, %v450_v19 }
  0xb4   : > { %930 = vrcp.f32 %v451_v20 }
  0xbe   : > { %v931_v21 = vpop.eup %930 }
  0xbf   : > { %v455_v22 = vsel %vm454_vm3, %v931_v21, 0.0 }
  0xc0   : > { %v456_v23 = vmul.f32 %v925_v16, %v455_v22  ;;  %v473_v24 = vmul.f32 %v927_v17, %v455_v22  ;;  %v493_v25 = vmul.f32 %v929_v18, %v455_v22 }
  0xc2   : > { %v459_v26 = vsel %vm457_vm0, %v456_v23, 0.0  ;;  %v477_v27 = vsel %vm474_vm1, %v473_v24, 0.0  ;;  %v497_v28 = vsel %vm494_vm2, %v493_v25, 0.0  ;;  %466 = vst [vmem:[%s415_s19] sm:$0xff] %v456_v23  ;;  %811 = vst [vmem:[%s415_s19 + $0x8] sm:$0xff] %v473_v24 }
  0xc3   : > { %818 = vst [vmem:[%s415_s19 + $0x10] sm:$0xff] %v493_v25  ;;  %462 = vst [vmem:[%s1501_s21] sm:$0xff] %v459_v26  ;;  %s1061_s19 = scalar_lea.vmem %s1060_s9, 768 }
  0xc4   : > { %p1063_p0 = scmp.lt.s32.totalorder %s1061_s19, %s1055_s15 }
  0xc6   : > { %p1064_p5 = por %p1063_p0, %p1062_p10 }
  0xc8   : > { %p1065_p2 = pnand %p1064_p5, %p1058_p9 }
  0xca   : > { %1068 = shalt.err (!%p1065_p2)
}
  0xcb   : > { %s1069_s27 = scalar_lea.hbm %s1498_s30, 384  ;;  %s1073_s13 = scalar_lea.hbm %s1637_s5, 768 }
  0xcc   : > { %p1070_p13 = scmp.ne.s32.totalorder %s1498_s30, %s1069_s27  ;;  %p1074_p12 = scmp.lt.u32.totalorder %s1498_s30, %s1637_s5 }
  0xcd   : > { %p1075_p6 = scmp.lt.u32.totalorder %s1073_s13, %s1069_s27  ;;  %p1077_p4 = scmp.lt.u32.totalorder %s1069_s27, %s1498_s30 }
  0xce   : > { %p1071_p11 = pnand %p1070_p13, %p1671_p1 }
  0xcf   : > { %p1076_p3 = por %p1075_p6, %p1074_p12 }
  0xd0   : > { %p1072_p7 = pneg %p1071_p11 }
  0xd1   : > { %p1078_p8 = por %p1077_p4, %p1076_p3 }
  0xd3   : > { %p1079_p9 = pnand %p1078_p8, %p1072_p7 }
  0xd5   : > { %1082 = shalt.err (!%p1079_p9)
}
  0xd6   : > { %s1213_s8 = smov 128   ;;  %s1214_s29 = smov 8   ;;  %809 = vst [vmem:[%s1501_s21 + $0x8] sm:$0xff] %v477_v27  ;;  %816 = vst [vmem:[%s1501_s21 + $0x10] sm:$0xff] %v497_v28 }
  0xd7   : > { %843 = dma.vmem_to_hbm [thread:$0]  (%p1671_p1), %s1505_s26, 384, %s1498_s30, %s1526_s23, %s1213_s8, %s1213_s8, %s1214_s29  }
  0xd8   : > { %s1083_s1 = scalar_lea.vmem %s1514_s28, 384  ;;  %s1215_s15 = smov [#allocation13]  }
  0xd9   : > { %p1084_p10 = scmp.ne.s32.totalorder %s1514_s28, %s1083_s1  ;;  %s1087_s7 = sshll.u32 %s1215_s15, 4  ;;  %s1088_s7 = int_to_ptr.vmem [resolvable:$false] %s1087_s7 }
  0xda   : > { %s1089_s9 = scalar_lea.vmem %s1088_s7, 768  ;;  %p1090_p2 = scmp.lt.s32.totalorder %s1514_s28, %s1088_s7 }
  0xdb   : > { %p1085_p0 = pnand %p1084_p10, %p1671_p1  ;;  %p1091_p13 = scmp.lt.s32.totalorder %s1089_s9, %s1083_s1 }
  0xdd   : > { %p1086_p5 = pneg %p1085_p0  ;;  %p1092_p11 = por %p1091_p13, %p1090_p2 }
  0xdf   : > { %p1093_p7 = pnand %p1092_p11, %p1086_p5 }
  0xe1   : > { %1096 = shalt.err (!%p1093_p7)
}
  0xe2   : > { %s1097_s26 = scalar_lea.hbm %s1512_s20, 384  ;;  %s1101_s19 = scalar_lea.hbm %s1638_s6, 768 }
  0xe3   : > { %p1098_p12 = scmp.ne.s32.totalorder %s1512_s20, %s1097_s26  ;;  %p1102_p4 = scmp.lt.u32.totalorder %s1512_s20, %s1638_s6 }
  0xe4   : > { %p1103_p8 = scmp.lt.u32.totalorder %s1101_s19, %s1097_s26  ;;  %p1105_p10 = scmp.lt.u32.totalorder %s1097_s26, %s1512_s20 }
  0xe5   : > { %p1099_p6 = pnand %p1098_p12, %p1671_p1 }
  0xe6   : > { %p1104_p9 = por %p1103_p8, %p1102_p4 }
  0xe7   : > { %p1100_p3 = pneg %p1099_p6 }
  0xe8   : > { %p1106_p0 = por %p1105_p10, %p1104_p9 }
  0xea   : > { %p1107_p5 = pnand %p1106_p0, %p1100_p3 }
  0xec   : > { %1110 = shalt.err (!%p1107_p5)
}
  0xed   : > { %844 = dma.vmem_to_hbm [thread:$0]  (%p1671_p1), %s1514_s28, 384, %s1512_s20, %s1526_s23, %s1213_s8, %s1213_s8, %s1214_s29  }
  0xee   : > { %s514_s12 = scalar_lea.sflag [#allocation4], %s1460_s11  ;;  %s1111_s13 = scalar_lea.vmem %s1521_s17, 384 }
  0xef   : > { %p1112_p2 = scmp.ne.s32.totalorder %s1521_s17, %s1111_s13  ;;  %s1216_s14 = smov [#allocation10]  }
  0xf0   : > { %s1115_s24 = sshll.u32 %s1216_s14, 4  ;;  %s1116_s24 = int_to_ptr.vmem [resolvable:$false] %s1115_s24 }
  0xf1   : > { %p1113_p13 = pnand %p1112_p2, %p1671_p1  ;;  %s1117_s1 = scalar_lea.vmem %s1116_s24, 768 }
  0xf2   : > { %p1118_p7 = scmp.lt.s32.totalorder %s1521_s17, %s1116_s24  ;;  %p1119_p12 = scmp.lt.s32.totalorder %s1117_s1, %s1111_s13 }
  0xf3   : > { %p1114_p11 = pneg %p1113_p13 }
  0xf4   : > { %p1120_p6 = por %p1119_p12, %p1118_p7 }
  0xf6   : > { %p1121_p3 = pnand %p1120_p6, %p1114_p11 }
  0xf8   : > { %1124 = shalt.err (!%p1121_p3)
}
  0xf9   : > { %s1125_s28 = scalar_lea.hbm %s1519_s18, 384  ;;  %s1129_s15 = scalar_lea.hbm %s1636_s4, 768 }
  0xfa   : > { %p1126_p4 = scmp.ne.s32.totalorder %s1519_s18, %s1125_s28  ;;  %p1130_p10 = scmp.lt.u32.totalorder %s1519_s18, %s1636_s4 }
  0xfb   : > { %p1131_p0 = scmp.lt.u32.totalorder %s1129_s15, %s1125_s28  ;;  %p1133_p2 = scmp.lt.u32.totalorder %s1125_s28, %s1519_s18 }
  0xfc   : > { %p1127_p8 = pnand %p1126_p4, %p1671_p1 }
  0xfd   : > { %p1132_p5 = por %p1131_p0, %p1130_p10 }
  0xfe   : > { %p1128_p9 = pneg %p1127_p8 }
  0xff   : > { %p1134_p13 = por %p1133_p2, %p1132_p5 }
 0x101   : > { %p1135_p11 = pnand %p1134_p13, %p1128_p9 }
 0x103   : > { %1138 = shalt.err (!%p1135_p11)
}
 0x104   : > { %842 = dma.vmem_to_hbm [thread:$0]  (%p1671_p1), %s1521_s17, 384, %s1519_s18, %s514_s12, %s1213_s8, %s1213_s8, %s1214_s29  }
 0x105 PF: > { %s1672_s26 = sld [smem:[#allocation19_spill]]  ;;  %s1673_s30 = sld [smem:[#allocation24_spill]] }
 0x106   : > { %s1674_s21 = sld [smem:[#allocation21_spill]] }
 0x10b   : > { %s584_s19 = sand.u32 1, %s1672_s26   ;;  %p1675_p7 = scmp.ne.s32.totalorder %s1673_s30, 0 }
 0x10c   : > { %p1676_p12 = scmp.ge.s32.totalorder %s1674_s21, 2  ;;  %s585_s27 = scalar_lea.sflag [#allocation4], %s584_s19 }
 0x10e   : > { %p862_p6 = pnand %p1676_p12, %p1675_p7 }
 0x110   : > { %1176 = dma.done.wait (!%p862_p6), %s585_s27, 384  }
 0x111   : > { %1178 = vsyncadd (!%p862_p6), %s585_s27, 4294966912  ;;  %s1677_s10 = sadd.s32 4294967294, %s1674_s21  }
 0x112   : > { %s593_s16 = sand.u32 1, %s1677_s10  }
 0x113   : > { %s594_s13 = scalar_lea.sflag [#allocation12], %s593_s16 }
 0x114   : > { %1180 = dma.done.wait (!%p862_p6), %s594_s13, 768  }
 0x115   : > { %1182 = vsyncadd (!%p862_p6), %s594_s13, 4294966528  ;;  %s32_s26 = sadd.s32 1, %s1674_s21   ;;  %s1678_s11 = sld [smem:[#allocation20_spill]] }
 0x116   : > { %p29_p1 = scmp.ge.s32.totalorder %s32_s26, 4   ;;  %s1679_s23 = sld [smem:[#allocation23_spill]] }
 0x117   : > { %s1680_s17 = sld [smem:[#allocation22_spill]]  ;;  %s1681_s21 = smov %s1189_s22 }
 0x118   : > { %s1683_s24 = smov %s1201_s25  ;;  %31 = sbr.rel (!%p29_p1) target bundleno = 14 (0xe), region = 160 }
 0x11b   : > { %s1682_s22 = smov %s1678_s11 }
 0x11d   : > { %s1684_s25 = smov %s1680_s17 }
 0x11f   :  { %608 = vsyncpa [#allocation3], 1 }
 0x120   :  { %610 = vsyncpa [#allocation3 + $0x1], 1 }
 0x121   :  { %611 = vsyncpa [#allocation6], 1 }
 0x122   :  { %613 = vsyncpa [#allocation6 + $0x1], 1 }
 0x123   :  { %614 = vsyncpa [#allocation9], 1 }
 0x124   :  { %616 = vsyncpa [#allocation9 + $0x1], 1 }
 0x125   :  { %617 = vsyncpa [#allocation4], 1 }
 0x126   :  { %619 = vsyncpa [#allocation4 + $0x1], 1 }
 0x127   :  { %620 = vsyncpa [#allocation12], 1 }
 0x128   :  { %622 = vsyncpa [#allocation12 + $0x1], 1 }

</bundles_post_ra>
